<compile_context>
chip_gen: v7x
topology: tpu7x:2x2x1
jax: 0.10.0
libtpu: 0.0.40
codegen_flags: <defaults>
</compile_context>

<pallas_src>
import jax
import jax.numpy as jnp
from jax.experimental import pallas as pl
from jax.experimental.pallas import tpu as pltpu


def _landmark_head_kernel(x_ref, w_ref, b_ref, o_ref):
    # x_ref: (Cin, tile_hw)   w_ref: (Cout, Cin)   b_ref: (Cout, 1)
    # o_ref: (Cout, tile_hw)  -- spatial tile on lanes (lane-dense stores).
    acc = jnp.dot(w_ref[...], x_ref[...], preferred_element_type=jnp.float32)
    o_ref[...] = (acc + b_ref[...].astype(jnp.float32)).astype(o_ref.dtype)


def _round_up(a, b):
    return ((a + b - 1) // b) * b


def landmark_head_forward(x_nchw, weight, bias, *, num_anchors=3, tile_hw=1024):
    """Pallas forward of RetinaFace LandmarkHead.

    x_nchw: (N, Cin, H, W); weight: (Cout, Cin, 1, 1); bias: (Cout,).
    Returns (N, H*W*num_anchors, 10), matching
    conv1x1(x).permute(0, 2, 3, 1).view(N, -1, 10).
    """
    N, Cin, H, W = x_nchw.shape
    Cout = weight.shape[0]
    assert Cout == num_anchors * 10, "LandmarkHead emits 10 values per anchor"

    HW = H * W
    # Spatial tile: multiple of 128 (lane width), clamped for small feature maps.
    tile = max(128, (int(tile_hw) // 128) * 128)
    tile = min(tile, _round_up(HW, 128))

    # Free reshape (contiguous last-dims merge); no transpose / no pad of the big tensor.
    x3 = x_nchw.reshape(N, Cin, HW)
    w_mat = weight.reshape(Cout, Cin).astype(x_nchw.dtype)   # (Cout, Cin)
    b_col = bias.reshape(Cout, 1)                            # (Cout, 1)

    grid = (N, pl.cdiv(HW, tile))   # both axes independent -> megacore-parallel

    cost = pl.CostEstimate(
        flops=2 * N * HW * Cin * Cout,
        transcendentals=0,
        bytes_accessed=x_nchw.dtype.itemsize
        * (N * HW * Cin + Cin * Cout + N * HW * Cout),
    )

    out3 = pl.pallas_call(
        _landmark_head_kernel,
        out_shape=jax.ShapeDtypeStruct((N, Cout, HW), x_nchw.dtype),
        grid_spec=pltpu.PrefetchScalarGridSpec(
            num_scalar_prefetch=0,
            grid=grid,
            in_specs=[
                pl.BlockSpec((None, Cin, tile), lambda n, j: (n, 0, j)),
                pl.BlockSpec((Cout, Cin), lambda n, j: (0, 0)),
                pl.BlockSpec((Cout, 1), lambda n, j: (0, 0)),
            ],
            out_specs=pl.BlockSpec((None, Cout, tile), lambda n, j: (n, 0, j)),
        ),
        compiler_params=pltpu.CompilerParams(
            dimension_semantics=("parallel", "parallel")),
        cost_estimate=cost,
    )(x3, w_mat, b_col)

    # Small layout glue on the (N, Cout=30, HW) result only (Cout << Cin):
    # (N, Cout, HW) -> (N, HW, Cout) -> (N, HW*num_anchors, 10)
    return jnp.transpose(out3, (0, 2, 1)).reshape(N, HW * num_anchors, 10)


if __name__ == "__main__":
    key = jax.random.PRNGKey(0)
    k_x, k_w, k_b = jax.random.split(key, 3)

    # Module-consistent shapes (default inchannels=512, num_anchors=3).
    # H=W=20 -> HW=400 exercises the ragged (non-multiple-of-128) boundary-block path.
    N, Cin, H, W = 2, 512, 20, 20
    num_anchors = 3
    Cout = num_anchors * 10

    x = jax.random.normal(k_x, (N, Cin, H, W), dtype=jnp.float32)
    # PyTorch Conv2d parameter shapes: (Cout, Cin, 1, 1) and (Cout,)
    weight = jax.random.normal(k_w, (Cout, Cin, 1, 1), dtype=jnp.float32) * 0.02
    bias = jax.random.normal(k_b, (Cout,), dtype=jnp.float32) * 0.01

    out = landmark_head_forward(x, weight, bias, num_anchors=num_anchors)
    out = jax.block_until_ready(out)

    # Pure-JAX reference of the PyTorch semantics.
    ref = jnp.einsum(
        "nchw,oc->nhwo", x, weight.reshape(Cout, Cin),
        precision=jax.lax.Precision.HIGHEST) + bias
    ref = ref.reshape(N, H * W * num_anchors, 10)

    assert out.shape == (N, H * W * num_anchors, 10)
    assert jnp.allclose(out, ref, atol=1e-4, rtol=1e-4)

    print("KERNEL_OK")
</pallas_src>

<mosaic_0001>
module attributes {stable_mosaic.version = 11 : i64} {
  func.func @_landmark_head_kernel(%arg0: i32, %arg1: i32, %arg2: memref<1x512x512xf32, #tpu.memory_space<vmem>>, %arg3: memref<30x512xf32, #tpu.memory_space<vmem>>, %arg4: memref<30x1xf32, #tpu.memory_space<vmem>>, %arg5: memref<1x30x512xf32, #tpu.memory_space<vmem>>) attributes {dimension_semantics = [#tpu.dimension_semantics<parallel>, #tpu.dimension_semantics<parallel>], iteration_bounds = array<i64: 2, 1>, scalar_prefetch = 0 : i64, scratch_operands = 0 : i64, tpu.core_type = #tpu.core_type<tc>, window_params = [{transform_indices = @transform_0, window_bounds = array<i64: 1, 512, 512>}, {pipeline_mode = #tpu.pipeline_mode<synchronous>, transform_indices = @transform_1, window_bounds = array<i64: 30, 512>}, {pipeline_mode = #tpu.pipeline_mode<synchronous>, transform_indices = @transform_2, window_bounds = array<i64: 30, 1>}, {transform_indices = @transform_3, window_bounds = array<i64: 1, 30, 512>}]} {
    %c0 = arith.constant 0 : index
    %c0_0 = arith.constant 0 : index
    %0 = vector.load %arg3[%c0, %c0_0] : memref<30x512xf32, #tpu.memory_space<vmem>>, vector<30x512xf32>
    %c0_1 = arith.constant 0 : index
    %c0_2 = arith.constant 0 : index
    %c0_3 = arith.constant 0 : index
    %1 = vector.load %arg2[%c0_1, %c0_2, %c0_3] : memref<1x512x512xf32, #tpu.memory_space<vmem>>, vector<1x512x512xf32>
    %2 = vector.shape_cast %1 : vector<1x512x512xf32> to vector<512x512xf32>
    %cst = arith.constant dense<0.000000e+00> : vector<30x512xf32>
    %3 = tpu.matmul %0, %2, %cst {dimension_numbers = #tpu.dot_dimension_numbers<[1], [0], [0], [1], [0, 0, 1, 1], [], []>} : vector<30x512xf32>, vector<512x512xf32>, vector<30x512xf32> -> vector<30x512xf32>
    %c0_4 = arith.constant 0 : index
    %c0_5 = arith.constant 0 : index
    %4 = vector.load %arg4[%c0_4, %c0_5] : memref<30x1xf32, #tpu.memory_space<vmem>>, vector<30x1xf32>
    %5 = vector.broadcast %4 : vector<30x1xf32> to vector<30x512xf32>
    %6 = arith.addf %3, %5 : vector<30x512xf32>
    %c0_6 = arith.constant 0 : index
    %c0_7 = arith.constant 0 : index
    %c0_8 = arith.constant 0 : index
    %7 = vector.load %arg5[%c0_6, %c0_7, %c0_8] : memref<1x30x512xf32, #tpu.memory_space<vmem>>, vector<1x30x512xf32>
    %8 = vector.shape_cast %7 : vector<1x30x512xf32> to vector<30x512xf32>
    %9 = vector.shape_cast %6 : vector<30x512xf32> to vector<1x30x512xf32>
    tpu.vector_store %arg5[%c0_6, %c0_7, %c0_8], %9 {strides = array<i32>} : memref<1x30x512xf32, #tpu.memory_space<vmem>>, vector<1x30x512xf32>,
    return
  }
  func.func @transform_0(%arg0: i32, %arg1: i32) -> (i32, i32, i32) {
    %c0_i32 = arith.constant 0 : i32
    %c0_i32_0 = arith.constant 0 : i32
    return %arg0, %c0_i32, %arg1 : i32, i32, i32
  }
  func.func @transform_1(%arg0: i32, %arg1: i32) -> (i32, i32) {
    %c0_i32 = arith.constant 0 : i32
    %c0_i32_0 = arith.constant 0 : i32
    %c0_i32_1 = arith.constant 0 : i32
    return %c0_i32, %c0_i32_0 : i32, i32
  }
  func.func @transform_2(%arg0: i32, %arg1: i32) -> (i32, i32) {
    %c0_i32 = arith.constant 0 : i32
    %c0_i32_0 = arith.constant 0 : i32
    %c0_i32_1 = arith.constant 0 : i32
    return %c0_i32, %c0_i32_0 : i32, i32
  }
  func.func @transform_3(%arg0: i32, %arg1: i32) -> (i32, i32, i32) {
    %c0_i32 = arith.constant 0 : i32
    %c0_i32_0 = arith.constant 0 : i32
    return %arg0, %c0_i32, %arg1 : i32, i32, i32
  }
}

</mosaic_0001>

<bundles_post_ra>
// kernel: tpu_custom_call.1
= control target key start
LH: loop header
LB: loop body
LE: loop exit
PB: predicated region body
PF: predicated region fallthrough
CT: control target
= control target key end

     0   :  { %s1338_s12 = smov 0   ;;  %s1340_s13 = smov 0   ;;  %s1711_s0 = inlined_call_operand.vmem [shape: f32[2,512,400], index: 0, kind: input, shape index: {}]   ;;  %s1712_s1 = inlined_call_operand.vmem [shape: f32[30,512], index: 1, kind: input, shape index: {}]   ;;  %s1713_s2 = inlined_call_operand.vmem [shape: f32[30,1], index: 2, kind: input, shape index: {}]   ;;  %s1714_s3 = inlined_call_operand.vmem [shape: f32[2,30,400], index: 3, kind: output, shape index: {}]  }
   0x1   :  { %s1342_s14 = smov 0  }
   0x2 LB: > { %s25_s15 = sadd.s32 1, %s1311_s13  ;;  %p969_p0 = scmp.ge.s32.totalorder %s1315_s14, 1  ;;  %s1315_s14 = sphi %s1342_s14, %s13_s14   ;;  %s1311_s13 = sphi %s1340_s13, %s1716_s13   ;;  %s1307_s12 = sphi %s1338_s12, %s1715_s12  }
   0x3   : > { %p27_p1 = scmp.ge.s32.totalorder %s25_s15, 2  ;;  %p158_p2 = scmp.lt.s32.totalorder %s1315_s14, 3 }
   0x5   : > { %s1718_s15 = smov (%p27_p1, %s25_s15), 0  ;;  %p159_p3 = pnand %p969_p0, %p158_p2 }
   0x6   : > { %p191_p4 = scmp.lt.s32.totalorder (!%p159_p3), %s1307_s12, 1  ;;  %v211_v0 = vld [vmem:[%s1712_s1 + $0x8] sm:$0xff] (!%p159_p3) }
   0x7   : > { %162 = sbr.rel (%p159_p3) target bundleno = 378 (0x17a), region = 32  ;;  %570 = vmatprep.mubr.f32.mxu0 (!%p159_p3), %v211_v0  ;;  %748 = vmatprep.mubr.f32.mxu1 (!%p159_p3), %v211_v0 }
   0xe   : > { %s1720_s12 = smov (!%p191_p4, %s1307_s12), 1 }
   0xf   : > { %s976_s18 = sshll.u32 %s1720_s12, 11  ;;  %s977_s10 = sshll.u32 %s1720_s12, 7 }
  0x10   : > { %s1365_s21 = scalar_lea.vmem %s1711_s0, %s976_s18  ;;  %s1684_s17 = scalar_lea.vmem %s1714_s3, %s977_s10 }
  0x11   : > { %v227_v1 = vld [vmem:[%s1365_s21 + $0x8] sm:$0xff]  ;;  %v229_v3 = vld [vmem:[%s1365_s21 + $0x18] sm:$0xff]  ;;  %v226_v6 = vld [vmem:[%s1365_s21] sm:$0xff] }
  0x12   : > { %v231_v2 = vld [vmem:[%s1365_s21 + $0x28] sm:$0xff]  ;;  %v233_v5 = vld [vmem:[%s1365_s21 + $0x38] sm:$0xff]  ;;  %v230_v7 = vld [vmem:[%s1365_s21 + $0x20] sm:$0xff] }
  0x13   : > { %v978_v4 = vpack.c.bf16 %v231_v2, %v227_v1  ;;  %v1106_v8 = vpack.c.bf16 %v233_v5, %v229_v3  ;;  %v980_v9 = vpack.c.bf16 %v230_v7, %v226_v6  ;;  %v228_v10 = vld [vmem:[%s1365_s21 + $0x10] sm:$0xff]  ;;  %v235_v12 = vld [vmem:[%s1365_s21 + $0x48] sm:$0xff]  ;;  %v237_v15 = vld [vmem:[%s1365_s21 + $0x58] sm:$0xff] }
  0x14   : > { %v232_v11 = vld [vmem:[%s1365_s21 + $0x30] sm:$0xff]  ;;  %v239_v14 = vld [vmem:[%s1365_s21 + $0x68] sm:$0xff]  ;;  %v241_v16 = vld [vmem:[%s1365_s21 + $0x78] sm:$0xff] }
  0x15   : > { %979 = vmatprep.subr.bf16.mxu0 %v978_v4  ;;  %v1108_v13 = vpack.c.bf16 %v232_v11, %v228_v10  ;;  %1107 = vmatprep.subr.bf16.mxu1 %v1106_v8  ;;  %v982_v17 = vpack.c.bf16 %v239_v14, %v235_v12  ;;  %v1110_v18 = vpack.c.bf16 %v241_v16, %v237_v15  ;;  %v234_v19 = vld [vmem:[%s1365_s21 + $0x40] sm:$0xff]  ;;  %v236_v21 = vld [vmem:[%s1365_s21 + $0x50] sm:$0xff]  ;;  %v243_v24 = vld [vmem:[%s1365_s21 + $0x88] sm:$0xff] }
  0x16   : > { %981 = vmatpush1.bf16.msra.mxu0 %v980_v9  ;;  %v238_v20 = vld [vmem:[%s1365_s21 + $0x60] sm:$0xff]  ;;  %v240_v23 = vld [vmem:[%s1365_s21 + $0x70] sm:$0xff]  ;;  %v247_v25 = vld [vmem:[%s1365_s21 + $0xa8] sm:$0xff]  ;;  %v1317_v9 = vmov 0  }
  0x17   : > { %1109 = vmatpush1.bf16.msra.mxu1 %v1108_v13  ;;  %v984_v22 = vpack.c.bf16 %v238_v20, %v234_v19  ;;  %983 = vmatprep.subr.bf16.mxu0 %v982_v17  ;;  %v1112_v26 = vpack.c.bf16 %v240_v23, %v236_v21  ;;  %v986_v27 = vpack.c.bf16 %v247_v25, %v243_v24  ;;  %v245_v28 = vld [vmem:[%s1365_s21 + $0x98] sm:$0xff]  ;;  %v242_v30 = vld [vmem:[%s1365_s21 + $0x80] sm:$0xff]  ;;  %v244_v33 = vld [vmem:[%s1365_s21 + $0x90] sm:$0xff] }
  0x18   : > { %1111 = vmatprep.subr.bf16.mxu1 %v1110_v18  ;;  %v249_v29 = vld [vmem:[%s1365_s21 + $0xb8] sm:$0xff]  ;;  %v246_v32 = vld [vmem:[%s1365_s21 + $0xa0] sm:$0xff]  ;;  %v248_v34 = vld [vmem:[%s1365_s21 + $0xb0] sm:$0xff]  ;;  %1291 = vset.pattern.permute.xlu0 %v1317_v9 }
  0x19   : > { %v1114_v31 = vpack.c.bf16 %v249_v29, %v245_v28  ;;  %v988_v35 = vpack.c.bf16 %v246_v32, %v242_v30  ;;  %v251_v36 = vld [vmem:[%s1365_s21 + $0xc8] sm:$0xff]  ;;  %v253_v38 = vld [vmem:[%s1365_s21 + $0xd8] sm:$0xff]  ;;  %v1116_v39 = vpack.c.bf16 %v248_v34, %v244_v33  ;;  %v250_v42 = vld [vmem:[%s1365_s21 + $0xc0] sm:$0xff]  ;;  %1292 = vset.pattern.permute.xlu1 %v1317_v9 }
  0x1a   : > { %985 = vmatpush1.bf16.msra.mxu0 %v984_v22  ;;  %v255_v37 = vld [vmem:[%s1365_s21 + $0xe8] sm:$0xff]  ;;  %v257_v41 = vld [vmem:[%s1365_s21 + $0xf8] sm:$0xff]  ;;  %v254_v43 = vld [vmem:[%s1365_s21 + $0xe0] sm:$0xff] }
  0x1b   : > { %1113 = vmatpush1.bf16.msra.mxu1 %v1112_v26  ;;  %987 = vmatprep.subr.bf16.mxu0 %v986_v27  ;;  %v990_v40 = vpack.c.bf16 %v255_v37, %v251_v36  ;;  %v1118_v44 = vpack.c.bf16 %v257_v41, %v253_v38  ;;  %v252_v45 = vld [vmem:[%s1365_s21 + $0xd0] sm:$0xff]  ;;  %v259_v47 = vld [vmem:[%s1365_s21 + $0x108] sm:$0xff]  ;;  %v261_v49 = vld [vmem:[%s1365_s21 + $0x118] sm:$0xff]  ;;  %v992_v51 = vpack.c.bf16 %v254_v43, %v250_v42 }
  0x1c   : > { %1115 = vmatprep.subr.bf16.mxu1 %v1114_v31  ;;  %v256_v46 = vld [vmem:[%s1365_s21 + $0xf0] sm:$0xff]  ;;  %v263_v48 = vld [vmem:[%s1365_s21 + $0x128] sm:$0xff]  ;;  %v265_v50 = vld [vmem:[%s1365_s21 + $0x138] sm:$0xff] }
  0x1d   : > { %v1120_v52 = vpack.c.bf16 %v256_v46, %v252_v45  ;;  %v994_v53 = vpack.c.bf16 %v263_v48, %v259_v47  ;;  %v258_v54 = vld [vmem:[%s1365_s21 + $0x100] sm:$0xff]  ;;  %v260_v56 = vld [vmem:[%s1365_s21 + $0x110] sm:$0xff]  ;;  %v1122_v57 = vpack.c.bf16 %v265_v50, %v261_v49  ;;  %v267_v59 = vld [vmem:[%s1365_s21 + $0x148] sm:$0xff] }
  0x1e   : > { %989 = vmatpush1.bf16.msra.mxu0 %v988_v35  ;;  %v262_v55 = vld [vmem:[%s1365_s21 + $0x120] sm:$0xff]  ;;  %v264_v58 = vld [vmem:[%s1365_s21 + $0x130] sm:$0xff]  ;;  %v271_v60 = vld [vmem:[%s1365_s21 + $0x168] sm:$0xff] }
  0x1f   : > { %1117 = vmatpush1.bf16.msra.mxu1 %v1116_v39  ;;  %991 = vmatprep.subr.bf16.mxu0 %v990_v40  ;;  %v269_v61 = vld [vmem:[%s1365_s21 + $0x158] sm:$0xff]  ;;  %v996_v63 = vpack.c.bf16 %v262_v55, %v258_v54  ;;  %v1124_v0 = vpack.c.bf16 %v264_v58, %v260_v56  ;;  %v998_v1 = vpack.c.bf16 %v271_v60, %v267_v59  ;;  %v266_v2 = vld [vmem:[%s1365_s21 + $0x140] sm:$0xff]  ;;  %v268_v4 = vld [vmem:[%s1365_s21 + $0x150] sm:$0xff] }
  0x20   : > { %1119 = vmatprep.subr.bf16.mxu1 %v1118_v44  ;;  %v273_v62 = vld [vmem:[%s1365_s21 + $0x178] sm:$0xff]  ;;  %v270_v3 = vld [vmem:[%s1365_s21 + $0x160] sm:$0xff]  ;;  %v272_v6 = vld [vmem:[%s1365_s21 + $0x170] sm:$0xff] }
  0x21   : > { %v1126_v5 = vpack.c.bf16 %v273_v62, %v269_v61  ;;  %v275_v7 = vld [vmem:[%s1365_s21 + $0x188] sm:$0xff]  ;;  %v277_v10 = vld [vmem:[%s1365_s21 + $0x198] sm:$0xff]  ;;  %v1000_v12 = vpack.c.bf16 %v270_v3, %v266_v2  ;;  %v1128_v13 = vpack.c.bf16 %v272_v6, %v268_v4  ;;  %v274_v15 = vld [vmem:[%s1365_s21 + $0x180] sm:$0xff] }
  0x22   : > { %993 = vmatpush1.bf16.msra.mxu0 %v992_v51  ;;  %v279_v8 = vld [vmem:[%s1365_s21 + $0x1a8] sm:$0xff]  ;;  %v281_v11 = vld [vmem:[%s1365_s21 + $0x1b8] sm:$0xff]  ;;  %v278_v16 = vld [vmem:[%s1365_s21 + $0x1a0] sm:$0xff] }
  0x23   : > { %1121 = vmatpush1.bf16.msra.mxu1 %v1120_v52  ;;  %995 = vmatprep.subr.bf16.mxu0 %v994_v53  ;;  %v1002_v14 = vpack.c.bf16 %v279_v8, %v275_v7  ;;  %v276_v17 = vld [vmem:[%s1365_s21 + $0x190] sm:$0xff]  ;;  %v1130_v18 = vpack.c.bf16 %v281_v11, %v277_v10  ;;  %v283_v20 = vld [vmem:[%s1365_s21 + $0x1c8] sm:$0xff]  ;;  %v285_v22 = vld [vmem:[%s1365_s21 + $0x1d8] sm:$0xff]  ;;  %v1004_v24 = vpack.c.bf16 %v278_v16, %v274_v15 }
  0x24   : > { %1123 = vmatprep.subr.bf16.mxu1 %v1122_v57  ;;  %v280_v19 = vld [vmem:[%s1365_s21 + $0x1b0] sm:$0xff]  ;;  %v287_v21 = vld [vmem:[%s1365_s21 + $0x1e8] sm:$0xff]  ;;  %v289_v23 = vld [vmem:[%s1365_s21 + $0x1f8] sm:$0xff] }
  0x25   : > { %v1132_v25 = vpack.c.bf16 %v280_v19, %v276_v17  ;;  %v1006_v26 = vpack.c.bf16 %v287_v21, %v283_v20  ;;  %v282_v27 = vld [vmem:[%s1365_s21 + $0x1c0] sm:$0xff]  ;;  %v284_v29 = vld [vmem:[%s1365_s21 + $0x1d0] sm:$0xff]  ;;  %v1134_v30 = vpack.c.bf16 %v289_v23, %v285_v22  ;;  %v291_v32 = vld [vmem:[%s1365_s21 + $0x208] sm:$0xff] }
  0x26   : > { %997 = vmatpush1.bf16.msra.mxu0 %v996_v63  ;;  %v286_v28 = vld [vmem:[%s1365_s21 + $0x1e0] sm:$0xff]  ;;  %v288_v31 = vld [vmem:[%s1365_s21 + $0x1f0] sm:$0xff]  ;;  %v295_v33 = vld [vmem:[%s1365_s21 + $0x228] sm:$0xff] }
  0x27   : > { %1125 = vmatpush1.bf16.msra.mxu1 %v1124_v0  ;;  %999 = vmatprep.subr.bf16.mxu0 %v998_v1  ;;  %v293_v34 = vld [vmem:[%s1365_s21 + $0x218] sm:$0xff]  ;;  %v1008_v36 = vpack.c.bf16 %v286_v28, %v282_v27  ;;  %v1136_v37 = vpack.c.bf16 %v288_v31, %v284_v29  ;;  %v1010_v38 = vpack.c.bf16 %v295_v33, %v291_v32  ;;  %v290_v39 = vld [vmem:[%s1365_s21 + $0x200] sm:$0xff]  ;;  %v292_v41 = vld [vmem:[%s1365_s21 + $0x210] sm:$0xff] }
  0x28   : > { %1127 = vmatprep.subr.bf16.mxu1 %v1126_v5  ;;  %v297_v35 = vld [vmem:[%s1365_s21 + $0x238] sm:$0xff]  ;;  %v294_v40 = vld [vmem:[%s1365_s21 + $0x220] sm:$0xff]  ;;  %v296_v43 = vld [vmem:[%s1365_s21 + $0x230] sm:$0xff] }
  0x29   : > { %v1138_v42 = vpack.c.bf16 %v297_v35, %v293_v34  ;;  %v299_v44 = vld [vmem:[%s1365_s21 + $0x248] sm:$0xff]  ;;  %v301_v46 = vld [vmem:[%s1365_s21 + $0x258] sm:$0xff]  ;;  %v1012_v48 = vpack.c.bf16 %v294_v40, %v290_v39  ;;  %v1140_v49 = vpack.c.bf16 %v296_v43, %v292_v41  ;;  %v298_v51 = vld [vmem:[%s1365_s21 + $0x240] sm:$0xff] }
  0x2a   : > { %1001 = vmatpush1.bf16.msra.mxu0 %v1000_v12  ;;  %v303_v45 = vld [vmem:[%s1365_s21 + $0x268] sm:$0xff]  ;;  %v305_v47 = vld [vmem:[%s1365_s21 + $0x278] sm:$0xff]  ;;  %v302_v52 = vld [vmem:[%s1365_s21 + $0x260] sm:$0xff] }
  0x2b   : > { %1129 = vmatpush1.bf16.msra.mxu1 %v1128_v13  ;;  %1003 = vmatprep.subr.bf16.mxu0 %v1002_v14  ;;  %v1014_v50 = vpack.c.bf16 %v303_v45, %v299_v44  ;;  %v300_v53 = vld [vmem:[%s1365_s21 + $0x250] sm:$0xff]  ;;  %v1142_v54 = vpack.c.bf16 %v305_v47, %v301_v46  ;;  %v307_v56 = vld [vmem:[%s1365_s21 + $0x288] sm:$0xff]  ;;  %v309_v58 = vld [vmem:[%s1365_s21 + $0x298] sm:$0xff]  ;;  %v1016_v60 = vpack.c.bf16 %v302_v52, %v298_v51 }
  0x2c   : > { %1131 = vmatprep.subr.bf16.mxu1 %v1130_v18  ;;  %v304_v55 = vld [vmem:[%s1365_s21 + $0x270] sm:$0xff]  ;;  %v311_v57 = vld [vmem:[%s1365_s21 + $0x2a8] sm:$0xff]  ;;  %v313_v59 = vld [vmem:[%s1365_s21 + $0x2b8] sm:$0xff] }
  0x2d   : > { %v1144_v61 = vpack.c.bf16 %v304_v55, %v300_v53  ;;  %v1018_v62 = vpack.c.bf16 %v311_v57, %v307_v56  ;;  %v306_v63 = vld [vmem:[%s1365_s21 + $0x280] sm:$0xff]  ;;  %v308_v1 = vld [vmem:[%s1365_s21 + $0x290] sm:$0xff]  ;;  %v1146_v2 = vpack.c.bf16 %v313_v59, %v309_v58  ;;  %v315_v4 = vld [vmem:[%s1365_s21 + $0x2c8] sm:$0xff] }
  0x2e   : > { %1005 = vmatpush1.bf16.msra.mxu0 %v1004_v24  ;;  %v310_v0 = vld [vmem:[%s1365_s21 + $0x2a0] sm:$0xff]  ;;  %v312_v3 = vld [vmem:[%s1365_s21 + $0x2b0] sm:$0xff]  ;;  %v319_v5 = vld [vmem:[%s1365_s21 + $0x2e8] sm:$0xff] }
  0x2f   : > { %1133 = vmatpush1.bf16.msra.mxu1 %v1132_v25  ;;  %1007 = vmatprep.subr.bf16.mxu0 %v1006_v26  ;;  %v317_v6 = vld [vmem:[%s1365_s21 + $0x2d8] sm:$0xff]  ;;  %v1020_v8 = vpack.c.bf16 %v310_v0, %v306_v63  ;;  %v1148_v9 = vpack.c.bf16 %v312_v3, %v308_v1  ;;  %v1022_v10 = vpack.c.bf16 %v319_v5, %v315_v4  ;;  %v314_v11 = vld [vmem:[%s1365_s21 + $0x2c0] sm:$0xff]  ;;  %v316_v13 = vld [vmem:[%s1365_s21 + $0x2d0] sm:$0xff] }
  0x30   : > { %1135 = vmatprep.subr.bf16.mxu1 %v1134_v30  ;;  %v321_v7 = vld [vmem:[%s1365_s21 + $0x2f8] sm:$0xff]  ;;  %v318_v12 = vld [vmem:[%s1365_s21 + $0x2e0] sm:$0xff]  ;;  %v320_v15 = vld [vmem:[%s1365_s21 + $0x2f0] sm:$0xff] }
  0x31   : > { %v1150_v14 = vpack.c.bf16 %v321_v7, %v317_v6  ;;  %v323_v16 = vld [vmem:[%s1365_s21 + $0x308] sm:$0xff]  ;;  %v325_v18 = vld [vmem:[%s1365_s21 + $0x318] sm:$0xff]  ;;  %v1024_v20 = vpack.c.bf16 %v318_v12, %v314_v11  ;;  %v1152_v21 = vpack.c.bf16 %v320_v15, %v316_v13  ;;  %v322_v23 = vld [vmem:[%s1365_s21 + $0x300] sm:$0xff] }
  0x32   : > { %1009 = vmatpush1.bf16.msra.mxu0 %v1008_v36  ;;  %v327_v17 = vld [vmem:[%s1365_s21 + $0x328] sm:$0xff]  ;;  %v329_v19 = vld [vmem:[%s1365_s21 + $0x338] sm:$0xff]  ;;  %v326_v24 = vld [vmem:[%s1365_s21 + $0x320] sm:$0xff] }
  0x33   : > { %1137 = vmatpush1.bf16.msra.mxu1 %v1136_v37  ;;  %1011 = vmatprep.subr.bf16.mxu0 %v1010_v38  ;;  %v1026_v22 = vpack.c.bf16 %v327_v17, %v323_v16  ;;  %v324_v25 = vld [vmem:[%s1365_s21 + $0x310] sm:$0xff]  ;;  %v1154_v26 = vpack.c.bf16 %v329_v19, %v325_v18  ;;  %v331_v28 = vld [vmem:[%s1365_s21 + $0x348] sm:$0xff]  ;;  %v333_v30 = vld [vmem:[%s1365_s21 + $0x358] sm:$0xff]  ;;  %v1028_v32 = vpack.c.bf16 %v326_v24, %v322_v23 }
  0x34   : > { %1139 = vmatprep.subr.bf16.mxu1 %v1138_v42  ;;  %v328_v27 = vld [vmem:[%s1365_s21 + $0x330] sm:$0xff]  ;;  %v335_v29 = vld [vmem:[%s1365_s21 + $0x368] sm:$0xff]  ;;  %v337_v31 = vld [vmem:[%s1365_s21 + $0x378] sm:$0xff] }
  0x35   : > { %v1156_v33 = vpack.c.bf16 %v328_v27, %v324_v25  ;;  %v1030_v34 = vpack.c.bf16 %v335_v29, %v331_v28  ;;  %v330_v35 = vld [vmem:[%s1365_s21 + $0x340] sm:$0xff]  ;;  %v332_v37 = vld [vmem:[%s1365_s21 + $0x350] sm:$0xff]  ;;  %v1158_v38 = vpack.c.bf16 %v337_v31, %v333_v30  ;;  %v339_v40 = vld [vmem:[%s1365_s21 + $0x388] sm:$0xff] }
  0x36   : > { %1013 = vmatpush1.bf16.msra.mxu0 %v1012_v48  ;;  %v334_v36 = vld [vmem:[%s1365_s21 + $0x360] sm:$0xff]  ;;  %v336_v39 = vld [vmem:[%s1365_s21 + $0x370] sm:$0xff]  ;;  %v343_v41 = vld [vmem:[%s1365_s21 + $0x3a8] sm:$0xff] }
  0x37   : > { %1141 = vmatpush1.bf16.msra.mxu1 %v1140_v49  ;;  %1015 = vmatprep.subr.bf16.mxu0 %v1014_v50  ;;  %v341_v42 = vld [vmem:[%s1365_s21 + $0x398] sm:$0xff]  ;;  %v1032_v44 = vpack.c.bf16 %v334_v36, %v330_v35  ;;  %v1160_v45 = vpack.c.bf16 %v336_v39, %v332_v37  ;;  %v1034_v46 = vpack.c.bf16 %v343_v41, %v339_v40  ;;  %v338_v47 = vld [vmem:[%s1365_s21 + $0x380] sm:$0xff]  ;;  %v340_v49 = vld [vmem:[%s1365_s21 + $0x390] sm:$0xff] }
  0x38   : > { %1143 = vmatprep.subr.bf16.mxu1 %v1142_v54  ;;  %v345_v43 = vld [vmem:[%s1365_s21 + $0x3b8] sm:$0xff]  ;;  %v342_v48 = vld [vmem:[%s1365_s21 + $0x3a0] sm:$0xff]  ;;  %v344_v51 = vld [vmem:[%s1365_s21 + $0x3b0] sm:$0xff] }
  0x39   : > { %v1162_v50 = vpack.c.bf16 %v345_v43, %v341_v42  ;;  %v347_v52 = vld [vmem:[%s1365_s21 + $0x3c8] sm:$0xff]  ;;  %v349_v54 = vld [vmem:[%s1365_s21 + $0x3d8] sm:$0xff]  ;;  %v1036_v56 = vpack.c.bf16 %v342_v48, %v338_v47  ;;  %v1164_v57 = vpack.c.bf16 %v344_v51, %v340_v49  ;;  %v346_v59 = vld [vmem:[%s1365_s21 + $0x3c0] sm:$0xff] }
  0x3a   : > { %1017 = vmatpush1.bf16.msra.mxu0 %v1016_v60  ;;  %v351_v53 = vld [vmem:[%s1365_s21 + $0x3e8] sm:$0xff]  ;;  %v353_v55 = vld [vmem:[%s1365_s21 + $0x3f8] sm:$0xff]  ;;  %v350_v60 = vld [vmem:[%s1365_s21 + $0x3e0] sm:$0xff] }
  0x3b   : > { %1145 = vmatpush1.bf16.msra.mxu1 %v1144_v61  ;;  %1019 = vmatprep.subr.bf16.mxu0 %v1018_v62  ;;  %v1038_v58 = vpack.c.bf16 %v351_v53, %v347_v52  ;;  %v348_v61 = vld [vmem:[%s1365_s21 + $0x3d0] sm:$0xff]  ;;  %v1166_v62 = vpack.c.bf16 %v353_v55, %v349_v54  ;;  %v355_v0 = vld [vmem:[%s1365_s21 + $0x408] sm:$0xff]  ;;  %v361_v3 = vld [vmem:[%s1365_s21 + $0x438] sm:$0xff]  ;;  %v1040_v4 = vpack.c.bf16 %v350_v60, %v346_v59 }
  0x3c   : > { %1147 = vmatprep.subr.bf16.mxu1 %v1146_v2  ;;  %v352_v63 = vld [vmem:[%s1365_s21 + $0x3f0] sm:$0xff]  ;;  %v359_v1 = vld [vmem:[%s1365_s21 + $0x428] sm:$0xff]  ;;  %v357_v2 = vld [vmem:[%s1365_s21 + $0x418] sm:$0xff] }
  0x3d   : > { %v1168_v5 = vpack.c.bf16 %v352_v63, %v348_v61  ;;  %v1042_v6 = vpack.c.bf16 %v359_v1, %v355_v0  ;;  %v354_v7 = vld [vmem:[%s1365_s21 + $0x400] sm:$0xff]  ;;  %v360_v11 = vld [vmem:[%s1365_s21 + $0x430] sm:$0xff]  ;;  %v363_v12 = vld [vmem:[%s1365_s21 + $0x448] sm:$0xff] }
  0x3e   : > { %1021 = vmatpush1.bf16.msra.mxu0 %v1020_v8  ;;  %v358_v8 = vld [vmem:[%s1365_s21 + $0x420] sm:$0xff]  ;;  %v367_v13 = vld [vmem:[%s1365_s21 + $0x468] sm:$0xff]  ;;  %v369_v15 = vld [vmem:[%s1365_s21 + $0x478] sm:$0xff] }
  0x3f   : > { %1149 = vmatpush1.bf16.msra.mxu1 %v1148_v9  ;;  %1023 = vmatprep.subr.bf16.mxu0 %v1022_v10  ;;  %v356_v9 = vld [vmem:[%s1365_s21 + $0x410] sm:$0xff]  ;;  %v1170_v10 = vpack.c.bf16 %v361_v3, %v357_v2  ;;  %v210_v16 = vld [vmem:[%s1712_s1] sm:$0xff]  ;;  %v1044_v17 = vpack.c.bf16 %v358_v8, %v354_v7  ;;  %v1046_v19 = vpack.c.bf16 %v367_v13, %v363_v12  ;;  %v371_v25 = vld [vmem:[%s1365_s21 + $0x488] sm:$0xff] }
  0x40   : > { %1151 = vmatprep.subr.bf16.mxu1 %v1150_v14  ;;  %v365_v14 = vld [vmem:[%s1365_s21 + $0x458] sm:$0xff]  ;;  %v1172_v18 = vpack.c.bf16 %v360_v11, %v356_v9  ;;  %v368_v24 = vld [vmem:[%s1365_s21 + $0x470] sm:$0xff]  ;;  %v215_v29 = vld [vmem:[%s1712_s1 + $0x28] sm:$0xff] }
  0x41   : > { %v1174_v23 = vpack.c.bf16 %v369_v15, %v365_v14  ;;  %v373_v27 = vld [vmem:[%s1365_s21 + $0x498] sm:$0xff]  ;;  %v214_v31 = vld [vmem:[%s1712_s1 + $0x20] sm:$0xff]  ;;  %v372_v36 = vld [vmem:[%s1365_s21 + $0x490] sm:$0xff] }
  0x42   : > { %1025 = vmatpush1.bf16.msra.mxu0 %v1024_v20  ;;  %v362_v20 = vld [vmem:[%s1365_s21 + $0x440] sm:$0xff]  ;;  %v377_v28 = vld [vmem:[%s1365_s21 + $0x4b8] sm:$0xff]  ;;  %v379_v39 = vld [vmem:[%s1365_s21 + $0x4c8] sm:$0xff] }
  0x43   : > { %1153 = vmatpush1.bf16.msra.mxu1 %v1152_v21  ;;  %1027 = vmatprep.subr.bf16.mxu0 %v1026_v22  ;;  %v366_v21 = vld [vmem:[%s1365_s21 + $0x460] sm:$0xff]  ;;  %v364_v22 = vld [vmem:[%s1365_s21 + $0x450] sm:$0xff]  ;;  %v1178_v37 = vpack.c.bf16 %v377_v28, %v373_v27  ;;  %v383_v40 = vld [vmem:[%s1365_s21 + $0x4e8] sm:$0xff] }
  0x44   : > { %1155 = vmatprep.subr.bf16.mxu1 %v1154_v26  ;;  %v375_v26 = vld [vmem:[%s1365_s21 + $0x4a8] sm:$0xff]  ;;  %v1048_v30 = vpack.c.bf16 %v366_v21, %v362_v20  ;;  %v374_v35 = vld [vmem:[%s1365_s21 + $0x4a0] sm:$0xff]  ;;  %v381_v41 = vld [vmem:[%s1365_s21 + $0x4d8] sm:$0xff]  ;;  %v1054_v47 = vpack.c.bf16 %v383_v40, %v379_v39 }
  0x45   : > { %v385_v42 = vld [vmem:[%s1365_s21 + $0x4f8] sm:$0xff]  ;;  %v219_v43 = vld [vmem:[%s1712_s1 + $0x48] sm:$0xff]  ;;  %v378_v48 = vld [vmem:[%s1365_s21 + $0x4c0] sm:$0xff] }
  0x46   : > { %1029 = vmatpush1.bf16.msra.mxu0 %v1028_v32  ;;  %v1176_v32 = vpack.c.bf16 %v368_v24, %v364_v22  ;;  %v382_v49 = vld [vmem:[%s1365_s21 + $0x4e0] sm:$0xff]  ;;  %v1182_v51 = vpack.c.bf16 %v385_v42, %v381_v41  ;;  %v384_v52 = vld [vmem:[%s1365_s21 + $0x4f0] sm:$0xff]  ;;  %v387_v53 = vld [vmem:[%s1365_s21 + $0x508] sm:$0xff] }
  0x47   : > { %1157 = vmatpush1.bf16.msra.mxu1 %v1156_v33  ;;  %1031 = vmatprep.subr.bf16.mxu0 %v1030_v34  ;;  %v1050_v33 = vpack.c.bf16 %v375_v26, %v371_v25  ;;  %v370_v34 = vld [vmem:[%s1365_s21 + $0x480] sm:$0xff]  ;;  %v391_v54 = vld [vmem:[%s1365_s21 + $0x528] sm:$0xff]  ;;  %v389_v55 = vld [vmem:[%s1365_s21 + $0x518] sm:$0xff] }
  0x48   : > { %1159 = vmatprep.subr.bf16.mxu1 %v1158_v38  ;;  %v376_v38 = vld [vmem:[%s1365_s21 + $0x4b0] sm:$0xff]  ;;  %v222_v59 = vld [vmem:[%s1712_s1 + $0x60] sm:$0x3f]  ;;  %v1058_v61 = vpack.c.bf16 %v391_v54, %v387_v53  ;;  %v395_v3 = vld [vmem:[%s1365_s21 + $0x548] sm:$0xff] }
  0x49   : > { %v390_v63 = vld [vmem:[%s1365_s21 + $0x520] sm:$0xff]  ;;  %v388_v0 = vld [vmem:[%s1365_s21 + $0x510] sm:$0xff]  ;;  %v403_v15 = vld [vmem:[%s1365_s21 + $0x588] sm:$0xff] }
  0x4a   : > { %1033 = vmatpush1.bf16.msra.mxu0 %v1032_v44  ;;  %v1052_v44 = vpack.c.bf16 %v374_v35, %v370_v34  ;;  %v392_v2 = vld [vmem:[%s1365_s21 + $0x530] sm:$0xff]  ;;  %v398_v11 = vld [vmem:[%s1365_s21 + $0x560] sm:$0xff]  ;;  %v213_v25 = vld [vmem:[%s1712_s1 + $0x18] sm:$0xff] }
  0x4b   : > { %1161 = vmatpush1.bf16.msra.mxu1 %v1160_v45  ;;  %1035 = vmatprep.subr.bf16.mxu0 %v1034_v46  ;;  %v218_v45 = vld [vmem:[%s1712_s1 + $0x40] sm:$0xff]  ;;  %v1180_v46 = vpack.c.bf16 %v376_v38, %v372_v36  ;;  %v1188_v8 = vpack.c.bf16 %v392_v2, %v388_v0  ;;  %v396_v12 = vld [vmem:[%s1365_s21 + $0x550] sm:$0xff]  ;;  %v411_v28 = vld [vmem:[%s1365_s21 + $0x5c8] sm:$0xff] }
  0x4c   : > { %1163 = vmatprep.subr.bf16.mxu1 %v1162_v50  ;;  %v380_v50 = vld [vmem:[%s1365_s21 + $0x4d0] sm:$0xff]  ;;  %v402_v20 = vld [vmem:[%s1365_s21 + $0x580] sm:$0xff]  ;;  %v419_v42 = vld [vmem:[%s1365_s21 + $0x608] sm:$0xff] }
  0x4d   : > { %v1184_v60 = vpack.c.bf16 %v384_v52, %v380_v50  ;;  %v400_v14 = vld [vmem:[%s1365_s21 + $0x570] sm:$0xff]  ;;  %v414_v38 = vld [vmem:[%s1365_s21 + $0x5e0] sm:$0xff] }
  0x4e   : > { %1037 = vmatpush1.bf16.msra.mxu0 %v1036_v56  ;;  %v393_v56 = vld [vmem:[%s1365_s21 + $0x538] sm:$0xff]  ;;  %v1192_v21 = vpack.c.bf16 %v400_v14, %v396_v12  ;;  %v404_v24 = vld [vmem:[%s1365_s21 + $0x590] sm:$0xff]  ;;  %v422_v52 = vld [vmem:[%s1365_s21 + $0x620] sm:$0xff] }
  0x4f   : > { %1165 = vmatpush1.bf16.msra.mxu1 %v1164_v57  ;;  %1039 = vmatprep.subr.bf16.mxu0 %v1038_v58  ;;  %v223_v57 = vld [vmem:[%s1712_s1 + $0x68] sm:$0x3f]  ;;  %v1056_v58 = vpack.c.bf16 %v382_v49, %v378_v48  ;;  %v1186_v1 = vpack.c.bf16 %v393_v56, %v389_v55  ;;  %v408_v27 = vld [vmem:[%s1365_s21 + $0x5b0] sm:$0xff]  ;;  %v485_v48 = vld [vmem:[%s1713_s2 + $0x18] sm:$0x3f] }
  0x50   : > { %1167 = vmatprep.subr.bf16.mxu1 %v1166_v62  ;;  %v386_v62 = vld [vmem:[%s1365_s21 + $0x500] sm:$0xff]  ;;  %v484_v34 = vld [vmem:[%s1713_s2 + $0x10] sm:$0xff]  ;;  %v1196_v35 = vpack.c.bf16 %v408_v27, %v404_v24  ;;  %v427_v56 = vld [vmem:[%s1365_s21 + $0x648] sm:$0xff] }
  0x51   : > { %v1060_v7 = vpack.c.bf16 %v390_v63, %v386_v62  ;;  %v412_v39 = vld [vmem:[%s1365_s21 + $0x5d0] sm:$0xff]  ;;  %498 = vperm.xlu1 %1292, %v484_v34   ;;  %v426_v63 = vld [vmem:[%s1365_s21 + $0x640] sm:$0xff] }
  0x52   : > { %1041 = vmatpush1.bf16.msra.mxu0 %v1040_v4  ;;  %v399_v4 = vld [vmem:[%s1365_s21 + $0x568] sm:$0xff]  ;;  %v416_v41 = vld [vmem:[%s1365_s21 + $0x5f0] sm:$0xff]  ;;  %v430_v0 = vld [vmem:[%s1365_s21 + $0x660] sm:$0xff] }
  0x53   : > { %1169 = vmatpush1.bf16.msra.mxu1 %v1168_v5  ;;  %1043 = vmatprep.subr.bf16.mxu0 %v1042_v6  ;;  %v397_v5 = vld [vmem:[%s1365_s21 + $0x558] sm:$0xff]  ;;  %v1062_v9 = vpack.c.bf16 %v399_v4, %v395_v3  ;;  %v1200_v49 = vpack.c.bf16 %v416_v41, %v412_v39  ;;  %v420_v53 = vld [vmem:[%s1365_s21 + $0x610] sm:$0xff]  ;;  %v435_v4 = vld [vmem:[%s1365_s21 + $0x688] sm:$0xff] }
  0x54   : > { %1171 = vmatprep.subr.bf16.mxu1 %v1170_v10  ;;  %v401_v6 = vld [vmem:[%s1365_s21 + $0x578] sm:$0xff]  ;;  %v394_v10 = vld [vmem:[%s1365_s21 + $0x540] sm:$0xff]  ;;  %v424_v55 = vld [vmem:[%s1365_s21 + $0x630] sm:$0xff] }
  0x55   : > { %571 = vmatmul.mubr.f32.vlgmr.msra.gmra.mrb[0].mxu0 %v210_v16  ;;  %v1190_v13 = vpack.c.bf16 %v401_v6, %v397_v5  ;;  %503 = vperm.xlu1 %1292, %v485_v48   ;;  %v432_v3 = vld [vmem:[%s1365_s21 + $0x670] sm:$0xff]  ;;  %v439_v5 = vld [vmem:[%s1365_s21 + $0x6a8] sm:$0xff]  ;;  %v437_v6 = vld [vmem:[%s1365_s21 + $0x698] sm:$0xff] }
  0x56   : > { %1045 = vmatpush1.bf16.msra.mxu0 %v1044_v17  ;;  %749 = vmatmul.mubr.f32.vlgmr.msra.gmra.mrb[0].mxu1 %v210_v16  ;;  %v407_v16 = vld [vmem:[%s1365_s21 + $0x5a8] sm:$0xff]  ;;  %v405_v17 = vld [vmem:[%s1365_s21 + $0x598] sm:$0xff]  ;;  %v438_v12 = vld [vmem:[%s1365_s21 + $0x6a0] sm:$0xff] }
  0x57   : > { %1173 = vmatpush1.bf16.msra.mxu1 %v1172_v18  ;;  %1047 = vmatprep.subr.bf16.mxu0 %v1046_v19  ;;  %v409_v18 = vld [vmem:[%s1365_s21 + $0x5b8] sm:$0xff]  ;;  %v1064_v19 = vpack.c.bf16 %v398_v11, %v394_v10  ;;  %v1066_v22 = vpack.c.bf16 %v407_v16, %v403_v15  ;;  %v1082_v10 = vpack.c.bf16 %v439_v5, %v435_v4  ;;  %v434_v11 = vld [vmem:[%s1365_s21 + $0x680] sm:$0xff]  ;;  %v440_v15 = vld [vmem:[%s1365_s21 + $0x6b0] sm:$0xff] }
  0x58   : > { %1175 = vmatprep.subr.bf16.mxu1 %v1174_v23  ;;  %576 = vmatprep.mubr.f32.mxu0 %v215_v29  ;;  %v406_v23 = vld [vmem:[%s1365_s21 + $0x5a0] sm:$0xff]  ;;  %v1194_v26 = vpack.c.bf16 %v409_v18, %v405_v17  ;;  %v443_v16 = vld [vmem:[%s1365_s21 + $0x6c8] sm:$0xff]  ;;  %v445_v18 = vld [vmem:[%s1365_s21 + $0x6d8] sm:$0xff] }
  0x59   : > { %754 = vmatprep.mubr.f32.mxu1 %v215_v29  ;;  %577 = vmatmul.mubr.f32.gmra.mrb[2].mxu0 %v214_v31  ;;  %v415_v29 = vld [vmem:[%s1365_s21 + $0x5e8] sm:$0xff]  ;;  %v446_v24 = vld [vmem:[%s1365_s21 + $0x6e0] sm:$0xff]  ;;  %v448_v27 = vld [vmem:[%s1365_s21 + $0x6f0] sm:$0xff] }
  0x5a   : > { %1049 = vmatpush1.bf16.msra.mxu0 %v1048_v30  ;;  %755 = vmatmul.mubr.f32.gmra.mrb[2].mxu1 %v214_v31  ;;  %v413_v30 = vld [vmem:[%s1365_s21 + $0x5d8] sm:$0xff]  ;;  %v1070_v36 = vpack.c.bf16 %v415_v29, %v411_v28  ;;  %v447_v17 = vld [vmem:[%s1365_s21 + $0x6e8] sm:$0xff]  ;;  %v456_v39 = vld [vmem:[%s1365_s21 + $0x730] sm:$0xff] }
  0x5b   : > { %1177 = vmatpush1.bf16.msra.mxu1 %v1176_v32  ;;  %1051 = vmatprep.subr.bf16.mxu0 %v1050_v33  ;;  %v417_v31 = vld [vmem:[%s1365_s21 + $0x5f8] sm:$0xff]  ;;  %v1068_v32 = vpack.c.bf16 %v406_v23, %v402_v20  ;;  %v482_v33 = vld [vmem:[%s1713_s2] sm:$0xff]  ;;  %v1084_v20 = vpack.c.bf16 %v438_v12, %v434_v11  ;;  %v451_v28 = vld [vmem:[%s1365_s21 + $0x708] sm:$0xff] }
  0x5c   : > { %1179 = vmatprep.subr.bf16.mxu1 %v1178_v37  ;;  %582 = vmatprep.mubr.f32.mxu0 %v219_v43  ;;  %v410_v37 = vld [vmem:[%s1365_s21 + $0x5c0] sm:$0xff]  ;;  %v1198_v40 = vpack.c.bf16 %v417_v31, %v413_v30  ;;  %v455_v29 = vld [vmem:[%s1365_s21 + $0x728] sm:$0xff]  ;;  %v453_v30 = vld [vmem:[%s1365_s21 + $0x718] sm:$0xff] }
  0x5d   : > { %760 = vmatprep.mubr.f32.mxu1 %v219_v43  ;;  %583 = vmatmul.mubr.f32.gmra.mrb[4].mxu0 %v218_v45  ;;  %v423_v43 = vld [vmem:[%s1365_s21 + $0x628] sm:$0xff]  ;;  %v442_v23 = vld [vmem:[%s1365_s21 + $0x6c0] sm:$0xff]  ;;  %v457_v31 = vld [vmem:[%s1365_s21 + $0x738] sm:$0xff]  ;;  %v1090_v34 = vpack.c.bf16 %v455_v29, %v451_v28 }
  0x5e   : > { %1053 = vmatpush1.bf16.msra.mxu0 %v1052_v44  ;;  %761 = vmatmul.mubr.f32.gmra.mrb[4].mxu1 %v218_v45  ;;  %v421_v44 = vld [vmem:[%s1365_s21 + $0x618] sm:$0xff]  ;;  %v1074_v50 = vpack.c.bf16 %v423_v43, %v419_v42  ;;  %v463_v41 = vld [vmem:[%s1365_s21 + $0x768] sm:$0xff]  ;;  %v462_v48 = vld [vmem:[%s1365_s21 + $0x760] sm:$0xff] }
  0x5f   : > { %1181 = vmatpush1.bf16.msra.mxu1 %v1180_v46  ;;  %1055 = vmatprep.subr.bf16.mxu0 %v1054_v47  ;;  %v425_v45 = vld [vmem:[%s1365_s21 + $0x638] sm:$0xff]  ;;  %v483_v46 = vld [vmem:[%s1713_s2 + $0x8] sm:$0xff]  ;;  %v1072_v47 = vpack.c.bf16 %v414_v38, %v410_v37  ;;  %v452_v37 = vld [vmem:[%s1365_s21 + $0x710] sm:$0xff]  ;;  %v1218_v38 = vpack.c.bf16 %v457_v31, %v453_v30 }
  0x60   : > { %1183 = vmatprep.subr.bf16.mxu1 %v1182_v51  ;;  %588 = vmatprep.mubr.f32.mxu0 %v223_v57  ;;  %v418_v51 = vld [vmem:[%s1365_s21 + $0x600] sm:$0xff]  ;;  %v1202_v54 = vpack.c.bf16 %v425_v45, %v421_v44  ;;  %v461_v42 = vld [vmem:[%s1365_s21 + $0x758] sm:$0xff]  ;;  %v1220_v45 = vpack.c.bf16 %v456_v39, %v452_v37  ;;  %v480_v11 = vld [vmem:[%s1365_s21 + $0x7f0] sm:$0xff] }
  0x61   : > { %766 = vmatprep.mubr.f32.mxu1 %v223_v57  ;;  %589 = vmatmul.mubr.f32.gmra.mrb[6].mxu0 %v222_v59  ;;  %v431_v57 = vld [vmem:[%s1365_s21 + $0x668] sm:$0xff]  ;;  %v465_v43 = vld [vmem:[%s1365_s21 + $0x778] sm:$0xff] }
  0x62   : > { %1057 = vmatpush1.bf16.msra.mxu0 %v1056_v58  ;;  %767 = vmatmul.mubr.f32.gmra.mrb[6].mxu1 %v222_v59  ;;  %v429_v58 = vld [vmem:[%s1365_s21 + $0x658] sm:$0xff]  ;;  %v1078_v62 = vpack.c.bf16 %v431_v57, %v427_v56 }
  0x63   : > { %1185 = vmatpush1.bf16.msra.mxu1 %v1184_v60  ;;  %1059 = vmatprep.subr.bf16.mxu0 %v1058_v61  ;;  %v433_v59 = vld [vmem:[%s1365_s21 + $0x678] sm:$0xff]  ;;  %v1076_v60 = vpack.c.bf16 %v422_v52, %v418_v51  ;;  %v1204_v61 = vpack.c.bf16 %v424_v55, %v420_v53  ;;  %v464_v51 = vld [vmem:[%s1365_s21 + $0x770] sm:$0xff]  ;;  %v467_v52 = vld [vmem:[%s1365_s21 + $0x788] sm:$0xff] }
  0x64   : > { %1187 = vmatprep.subr.bf16.mxu1 %v1186_v1  ;;  %659 = vmatprep.mubr.f32.mxu0 %v213_v25  ;;  %v428_v1 = vld [vmem:[%s1365_s21 + $0x650] sm:$0xff]  ;;  %v1206_v2 = vpack.c.bf16 %v433_v59, %v429_v58  ;;  %v471_v53 = vld [vmem:[%s1365_s21 + $0x7a8] sm:$0xff]  ;;  %v473_v55 = vld [vmem:[%s1365_s21 + $0x7b8] sm:$0xff] }
  0x65   : > { %837 = vmatprep.mubr.f32.mxu1 %v213_v25  ;;  %488 = vperm.xlu0 %1291, %v482_v33   ;;  %v444_v25 = vld [vmem:[%s1365_s21 + $0x6d0] sm:$0xff]  ;;  %v1098_v58 = vpack.c.bf16 %v471_v53, %v467_v52  ;;  %v466_v59 = vld [vmem:[%s1365_s21 + $0x780] sm:$0xff] }
  0x66   : > { %1061 = vmatpush1.bf16.msra.mxu0 %v1060_v7  ;;  %v441_v7 = vld [vmem:[%s1365_s21 + $0x6b8] sm:$0xff]  ;;  %v1216_v33 = vpack.c.bf16 %v448_v27, %v444_v25 }
  0x67   : > { %1189 = vmatpush1.bf16.msra.mxu1 %v1188_v8  ;;  %1063 = vmatprep.subr.bf16.mxu0 %v1062_v9  ;;  %v1080_v8 = vpack.c.bf16 %v430_v0, %v426_v63  ;;  %v1208_v9 = vpack.c.bf16 %v432_v3, %v428_v1  ;;  %v1210_v14 = vpack.c.bf16 %v441_v7, %v437_v6  ;;  %v472_v63 = vld [vmem:[%s1365_s21 + $0x7b0] sm:$0xff]  ;;  %v475_v0 = vld [vmem:[%s1365_s21 + $0x7c8] sm:$0xff]  ;;  %v481_v3 = vld [vmem:[%s1365_s21 + $0x7f8] sm:$0xff] }
  0x68   : > { %1191 = vmatprep.subr.bf16.mxu1 %v1190_v13  ;;  %v436_v13 = vld [vmem:[%s1365_s21 + $0x690] sm:$0xff]  ;;  %v479_v1 = vld [vmem:[%s1365_s21 + $0x7e8] sm:$0xff]  ;;  %v474_v7 = vld [vmem:[%s1365_s21 + $0x7c0] sm:$0xff] }
  0x69   : > { %493 = vperm.xlu0 %1291, %v483_v46   ;;  %v1102_v6 = vpack.c.bf16 %v479_v1, %v475_v0 }
  0x6a   : > { %1065 = vmatpush1.bf16.msra.mxu0 %v1064_v19  ;;  %v449_v19 = vld [vmem:[%s1365_s21 + $0x6f8] sm:$0xff] }
  0x6b   : > { %1193 = vmatpush1.bf16.msra.mxu1 %v1192_v21  ;;  %1067 = vmatprep.subr.bf16.mxu0 %v1066_v22  ;;  %v1212_v21 = vpack.c.bf16 %v440_v15, %v436_v13  ;;  %v1086_v22 = vpack.c.bf16 %v447_v17, %v443_v16  ;;  %v217_v15 = vld [vmem:[%s1712_s1 + $0x38] sm:$0xff]  ;;  %v216_v16 = vld [vmem:[%s1712_s1 + $0x30] sm:$0xff] }
  0x6c   : > { %1195 = vmatprep.subr.bf16.mxu1 %v1194_v26  ;;  %v1214_v26 = vpack.c.bf16 %v449_v19, %v445_v18  ;;  %v221_v17 = vld [vmem:[%s1712_s1 + $0x58] sm:$0xff]  ;;  %v220_v18 = vld [vmem:[%s1712_s1 + $0x50] sm:$0xff] }
  0x6d   : > { %v225_v19 = vld [vmem:[%s1712_s1 + $0x78] sm:$0x3f] }
  0x6e   : > { %1069 = vmatpush1.bf16.msra.mxu0 %v1068_v32  ;;  %v1088_v32 = vpack.c.bf16 %v446_v24, %v442_v23 }
  0x6f   : > { %1197 = vmatpush1.bf16.msra.mxu1 %v1196_v35  ;;  %1071 = vmatprep.subr.bf16.mxu0 %v1070_v36  ;;  %v450_v35 = vld [vmem:[%s1365_s21 + $0x700] sm:$0xff] }
  0x70   : > { %1199 = vmatprep.subr.bf16.mxu1 %v1198_v40  ;;  %v454_v36 = vld [vmem:[%s1365_s21 + $0x720] sm:$0xff]  ;;  %v459_v40 = vld [vmem:[%s1365_s21 + $0x748] sm:$0xff] }
  0x71   : > { %v1092_v44 = vpack.c.bf16 %v454_v36, %v450_v35  ;;  %v1094_v46 = vpack.c.bf16 %v463_v41, %v459_v40 }
  0x72   : > { %1073 = vmatpush1.bf16.msra.mxu0 %v1072_v47  ;;  %v458_v47 = vld [vmem:[%s1365_s21 + $0x740] sm:$0xff] }
  0x73   : > { %1201 = vmatpush1.bf16.msra.mxu1 %v1200_v49  ;;  %1075 = vmatprep.subr.bf16.mxu0 %v1074_v50  ;;  %v460_v49 = vld [vmem:[%s1365_s21 + $0x750] sm:$0xff]  ;;  %v1222_v50 = vpack.c.bf16 %v465_v43, %v461_v42  ;;  %v1096_v56 = vpack.c.bf16 %v462_v48, %v458_v47 }
  0x74   : > { %1203 = vmatprep.subr.bf16.mxu1 %v1202_v54  ;;  %v469_v54 = vld [vmem:[%s1365_s21 + $0x798] sm:$0xff]  ;;  %v1224_v57 = vpack.c.bf16 %v464_v51, %v460_v49 }
  0x76   : > { %1077 = vmatpush1.bf16.msra.mxu0 %v1076_v60  ;;  %v470_v60 = vld [vmem:[%s1365_s21 + $0x7a0] sm:$0xff] }
  0x77   : > { %1205 = vmatpush1.bf16.msra.mxu1 %v1204_v61  ;;  %1079 = vmatprep.subr.bf16.mxu0 %v1078_v62  ;;  %v468_v61 = vld [vmem:[%s1365_s21 + $0x790] sm:$0xff]  ;;  %v1226_v62 = vpack.c.bf16 %v473_v55, %v469_v54  ;;  %v1100_v4 = vpack.c.bf16 %v470_v60, %v466_v59 }
  0x78   : > { %1207 = vmatprep.subr.bf16.mxu1 %v1206_v2  ;;  %v477_v2 = vld [vmem:[%s1365_s21 + $0x7d8] sm:$0xff]  ;;  %v1228_v5 = vpack.c.bf16 %v472_v63, %v468_v61 }
  0x7a   : > { %1081 = vmatpush1.bf16.msra.mxu0 %v1080_v8  ;;  %v478_v8 = vld [vmem:[%s1365_s21 + $0x7e0] sm:$0xff] }
  0x7b   : > { %1209 = vmatpush1.bf16.msra.mxu1 %v1208_v9  ;;  %1083 = vmatprep.subr.bf16.mxu0 %v1082_v10  ;;  %v1230_v9 = vpack.c.bf16 %v481_v3, %v477_v2  ;;  %v476_v10 = vld [vmem:[%s1365_s21 + $0x7d0] sm:$0xff]  ;;  %v1104_v12 = vpack.c.bf16 %v478_v8, %v474_v7 }
  0x7c   : > { %1211 = vmatprep.subr.bf16.mxu1 %v1210_v14  ;;  %v1232_v13 = vpack.c.bf16 %v480_v11, %v476_v10  ;;  %v212_v14 = vld [vmem:[%s1712_s1 + $0x10] sm:$0xff] }
  0x7e   : > { %1085 = vmatpush1.bf16.msra.mxu0 %v1084_v20  ;;  %v224_v20 = vld [vmem:[%s1712_s1 + $0x70] sm:$0x3f] }
  0x7f   : > { %1213 = vmatpush1.bf16.msra.mxu1 %v1212_v21  ;;  %1087 = vmatprep.subr.bf16.mxu0 %v1086_v22 }
  0x80   : > { %1215 = vmatprep.subr.bf16.mxu1 %v1214_v26 }
  0x82   : > { %1089 = vmatpush1.bf16.msra.mxu0 %v1088_v32 }
  0x83   : > { %1217 = vmatpush1.bf16.msra.mxu1 %v1216_v33  ;;  %1091 = vmatprep.subr.bf16.mxu0 %v1090_v34 }
  0x84   : > { %1219 = vmatprep.subr.bf16.mxu1 %v1218_v38 }
  0x86   : > { %1093 = vmatpush1.bf16.msra.mxu0 %v1092_v44 }
  0x87   : > { %1221 = vmatpush1.bf16.msra.mxu1 %v1220_v45  ;;  %1095 = vmatprep.subr.bf16.mxu0 %v1094_v46 }
  0x88   : > { %1223 = vmatprep.subr.bf16.mxu1 %v1222_v50 }
  0x8a   : > { %1097 = vmatpush1.bf16.msra.mxu0 %v1096_v56 }
  0x8b   : > { %1225 = vmatpush1.bf16.msra.mxu1 %v1224_v57  ;;  %1099 = vmatprep.subr.bf16.mxu0 %v1098_v58 }
  0x8c   : > { %1227 = vmatprep.subr.bf16.mxu1 %v1226_v62 }
  0x8e   : > { %1101 = vmatpush1.bf16.msra.mxu0 %v1100_v4 }
  0x8f   : > { %1229 = vmatpush1.bf16.msra.mxu1 %v1228_v5  ;;  %1103 = vmatprep.subr.bf16.mxu0 %v1102_v6 }
  0x90   : > { %1231 = vmatprep.subr.bf16.mxu1 %v1230_v9 }
  0x92   : > { %1105 = vmatpush1.bf16.msra.mxu0 %v1104_v12 }
  0x93   : > { %1233 = vmatpush1.bf16.msra.mxu1 %v1232_v13 }
  0x95   : > { %660 = vmatmul.mubr.f32.vlgmr.msra.gmra.mrb[0].mxu0 %v212_v14 }
  0x96   : > { %838 = vmatmul.mubr.f32.vlgmr.msra.gmra.mrb[0].mxu1 %v212_v14  ;;  %665 = vmatprep.mubr.f32.mxu0 %v217_v15 }
  0x97   : > { %843 = vmatprep.mubr.f32.mxu1 %v217_v15 }
  0x99   : > { %666 = vmatmul.mubr.f32.gmra.mrb[2].mxu0 %v216_v16 }
  0x9a   : > { %844 = vmatmul.mubr.f32.gmra.mrb[2].mxu1 %v216_v16  ;;  %671 = vmatprep.mubr.f32.mxu0 %v221_v17 }
  0x9b   : > { %849 = vmatprep.mubr.f32.mxu1 %v221_v17 }
  0x9d   : > { %672 = vmatmul.mubr.f32.gmra.mrb[4].mxu0 %v220_v18 }
  0x9e   : > { %850 = vmatmul.mubr.f32.gmra.mrb[4].mxu1 %v220_v18  ;;  %677 = vmatprep.mubr.f32.mxu0 %v225_v19 }
  0x9f   : > { %855 = vmatprep.mubr.f32.mxu1 %v225_v19 }
  0xa1   : > { %678 = vmatmul.mubr.f32.gmra.mrb[6].mxu0 %v224_v20 }
  0xa2   : > { %856 = vmatmul.mubr.f32.gmra.mrb[6].mxu1 %v224_v20 }
  0xd0   : > { %v499_v36 = vpop.permute.xlu1 %498 }
  0xd4   : > { %v504_v48 = vpop.permute.xlu1 %503 }
  0xe4   : > { %v489_v21 = vpop.permute.xlu0 %488 }
  0xe8   : > { %v494_v29 = vpop.permute.xlu0 %493 }
 0x168   : > { %v661_v22 = vpop.f32.mrb[0].mxu0 }
 0x169   : > { %v1234_v23 = vadd.f32 %v661_v22, %v489_v21  ;;  %v839_v24 = vpop.f32.mrb[0].mxu1  ;;  %v663_v25 = vpop.f32.mrb[1].mxu0 }
 0x16a   : > { %v1242_v26 = vadd.f32 %v839_v24, %v489_v21  ;;  %v1235_v27 = vadd.f32 %v663_v25, %v489_v21  ;;  %v841_v28 = vpop.f32.mrb[1].mxu1 }
 0x16b   : > { %862 = vst [vmem:[%s1684_s17] sm:$0xff] %v1234_v23  ;;  %v1243_v30 = vadd.f32 %v841_v28, %v489_v21 }
 0x16c   : > { %864 = vst [vmem:[%s1684_s17 + $0x10] sm:$0xff] %v1242_v26  ;;  %863 = vst [vmem:[%s1684_s17 + $0x8] sm:$0xff] %v1235_v27  ;;  %v667_v31 = vpop.f32.mrb[2].mxu0 }
 0x16d   : > { %865 = vst [vmem:[%s1684_s17 + $0x18] sm:$0xff] %v1243_v30  ;;  %v1236_v32 = vadd.f32 %v667_v31, %v494_v29  ;;  %v845_v33 = vpop.f32.mrb[2].mxu1  ;;  %v669_v34 = vpop.f32.mrb[3].mxu0 }
 0x16e   : > { %v1244_v35 = vadd.f32 %v845_v33, %v494_v29  ;;  %v1237_v37 = vadd.f32 %v669_v34, %v494_v29  ;;  %v847_v38 = vpop.f32.mrb[3].mxu1 }
 0x16f   : > { %866 = vst [vmem:[%s1684_s17 + $0x20] sm:$0xff] %v1236_v32  ;;  %v1245_v39 = vadd.f32 %v847_v38, %v494_v29 }
 0x170   : > { %868 = vst [vmem:[%s1684_s17 + $0x30] sm:$0xff] %v1244_v35  ;;  %867 = vst [vmem:[%s1684_s17 + $0x28] sm:$0xff] %v1237_v37  ;;  %v673_v40 = vpop.f32.mrb[4].mxu0 }
 0x171   : > { %869 = vst [vmem:[%s1684_s17 + $0x38] sm:$0xff] %v1245_v39  ;;  %v1238_v41 = vadd.f32 %v673_v40, %v499_v36  ;;  %v851_v42 = vpop.f32.mrb[4].mxu1  ;;  %v675_v43 = vpop.f32.mrb[5].mxu0 }
 0x172   : > { %v1246_v44 = vadd.f32 %v851_v42, %v499_v36  ;;  %v1239_v45 = vadd.f32 %v675_v43, %v499_v36  ;;  %v853_v46 = vpop.f32.mrb[5].mxu1 }
 0x173   : > { %870 = vst [vmem:[%s1684_s17 + $0x40] sm:$0xff] %v1238_v41  ;;  %v1247_v47 = vadd.f32 %v853_v46, %v499_v36 }
 0x174   : > { %872 = vst [vmem:[%s1684_s17 + $0x50] sm:$0xff] %v1246_v44  ;;  %871 = vst [vmem:[%s1684_s17 + $0x48] sm:$0xff] %v1239_v45  ;;  %v679_v49 = vpop.f32.mrb[6].mxu0 }
 0x175   : > { %873 = vst [vmem:[%s1684_s17 + $0x58] sm:$0xff] %v1247_v47  ;;  %v1240_v50 = vadd.f32 %v679_v49, %v504_v48  ;;  %v857_v51 = vpop.f32.mrb[6].mxu1  ;;  %v681_v52 = vpop.f32.mrb[7].mxu0 }
 0x176   : > { %v1248_v53 = vadd.f32 %v857_v51, %v504_v48  ;;  %v1241_v54 = vadd.f32 %v681_v52, %v504_v48  ;;  %v859_v55 = vpop.f32.mrb[7].mxu1 }
 0x177   : > { %874 = vst [vmem:[%s1684_s17 + $0x60] sm:$0x3f] %v1240_v50  ;;  %v1249_v56 = vadd.f32 %v859_v55, %v504_v48 }
 0x178   : > { %876 = vst [vmem:[%s1684_s17 + $0x70] sm:$0x3f] %v1248_v53  ;;  %875 = vst [vmem:[%s1684_s17 + $0x68] sm:$0x3f] %v1241_v54 }
 0x179   : > { %877 = vst [vmem:[%s1684_s17 + $0x78] sm:$0x3f] %v1249_v56 }
 0x17a PF: > { %s13_s14 = sadd.s32 1, %s1315_s14   ;;  %s1715_s12 = smov %s1311_s13 }
 0x17b   : > { %p10_p5 = scmp.ge.s32.totalorder %s13_s14, 4   ;;  %s1716_s13 = smov %s1718_s15 }
 0x17d   :  { %12 = sbr.rel (!%p10_p5) target bundleno = 2 (0x2), region = 62 }

</bundles_post_ra>
